<compile_context>
chip_gen: v6e
topology: v6e:2x2x1
jax: 0.10.0
libtpu: 0.0.40
codegen_flags: <defaults>
</compile_context>

<pallas_src>
import functools

import jax
import jax.numpy as jnp
from jax import lax
from jax.experimental import pallas as pl
from jax.experimental.pallas import tpu as pltpu

_VMEM_LIMIT = 32 * 1024 * 1024          # <= physical VMEM on v5e/v6e/v7x


# ---------------------------------------------------------------------------
# Pass 1: pooling + the two tiny attention heads (per batch, per H-tile).
# ---------------------------------------------------------------------------
def _pool_attn_kernel(x_ref, w1_ref, b1_ref, wh_ref, bh_ref, ww_ref, bw_ref,
                      ah_ref, aw_ref, xw_acc, *, inv_h):
    t = pl.program_id(1)

    x = x_ref[0].astype(jnp.float32)                      # (C, TH, W)

    # ---- H path: mean over W per row, conv1(+folded BN), h_swish, conv_h ----
    xh = jnp.mean(x, axis=2)                              # (C, TH)
    yh = jnp.dot(w1_ref[...], xh, preferred_element_type=jnp.float32) + b1_ref[...]
    yh = yh * jnp.clip(yh + 3.0, 0.0, 6.0) * (1.0 / 6.0)  # h_swish
    ah = jax.nn.sigmoid(
        jnp.dot(wh_ref[...], yh, preferred_element_type=jnp.float32) + bh_ref[...])
    ah_ref[0] = ah.T                                      # stored as (TH, C)

    # ---- W path: accumulate the over-H sum across tiles, finalize at the end
    @pl.when(t == 0)
    def _():
        xw_acc[...] = jnp.zeros_like(xw_acc)

    xw_acc[...] += jnp.sum(x, axis=1)                     # (C, W)

    @pl.when(t == pl.num_programs(1) - 1)
    def _():
        xw = xw_acc[...] * inv_h                          # mean over H
        yw = jnp.dot(w1_ref[...], xw, preferred_element_type=jnp.float32) + b1_ref[...]
        yw = yw * jnp.clip(yw + 3.0, 0.0, 6.0) * (1.0 / 6.0)
        aw_ref[0] = jax.nn.sigmoid(
            jnp.dot(ww_ref[...], yw, preferred_element_type=jnp.float32) + bw_ref[...])


# ---------------------------------------------------------------------------
# Pass 2: lane-dense gating  out[c, h*W + w] = x[c, h*W + w] * a_h[c,h] * a_w[c,w]
# ---------------------------------------------------------------------------
def _gate_kernel(xf_ref, ah_ref, aw_ref, sh_ref, sw_ref, out_ref):
    xf = xf_ref[0].astype(jnp.float32)                    # (C, TH*W)
    ah = ah_ref[0].astype(jnp.float32).T                  # (C, TH)
    aw = aw_ref[0].astype(jnp.float32)                    # (C, W)
    # Spread onto the flattened spatial axis with precomputed 0/1 matrices:
    #   sh[h, l] = (l // W == h)   -> ah_flat[c, l] = a_h[c, l // W]
    #   sw[w, l] = (l %  W == w)   -> aw_flat[c, l] = a_w[c, l %  W]
    ah_flat = jnp.dot(ah, sh_ref[...], preferred_element_type=jnp.float32)
    aw_flat = jnp.dot(aw, sw_ref[...], preferred_element_type=jnp.float32)
    out_ref[0] = (xf * ah_flat * aw_flat).astype(out_ref.dtype)


def _pick_h_tile(c, h, w, itemsize, budget_bytes):
    """Largest H-tile whose x block fits the budget and satisfies TPU tiling."""
    if c * h * w * itemsize <= budget_bytes:
        return h
    for th in range(h - 1, 0, -1):
        if (h % th == 0 and th % 8 == 0 and (th * w) % 128 == 0
                and c * th * w * itemsize <= budget_bytes):
            return th
    return h  # fall back to a full-H block


def ca_forward(x, params, *, eps=1e-5, h_tile=None,
               tile_budget_bytes=2 * 1024 * 1024):
    n, c, h, w = x.shape
    mip = params["w1"].shape[0]
    itemsize = jnp.dtype(x.dtype).itemsize

    # Fold BatchNorm (eval mode, running stats) into conv1; biases as columns.
    scale = params["gamma"] * lax.rsqrt(params["var"] + eps)          # (mip,)
    w1f = (params["w1"] * scale[:, None]).astype(jnp.float32)         # (mip, c)
    b1f = ((params["b1"] - params["mean"]) * scale
           + params["beta"]).reshape(mip, 1).astype(jnp.float32)
    wh = params["wh"].astype(jnp.float32)
    bh = params["bh"].reshape(c, 1).astype(jnp.float32)
    ww = params["ww"].astype(jnp.float32)
    bw = params["bw"].reshape(c, 1).astype(jnp.float32)

    if h_tile is None:
        h_tile = _pick_h_tile(c, h, w, itemsize, tile_budget_bytes)
    ht = h // h_tile

    def full(shape):
        return pl.BlockSpec(shape, lambda b, t, _n=len(shape): (0,) * _n)

    # ------------------- pass 1: pooling + attention vectors -----------------
    a_h, a_w = pl.pallas_call(
        functools.partial(_pool_attn_kernel, inv_h=1.0 / h),
        out_shape=(jax.ShapeDtypeStruct((n, h, c), jnp.float32),   # a_h as (H, C)
                   jax.ShapeDtypeStruct((n, c, w), jnp.float32)),  # a_w
        grid=(n, ht),
        in_specs=[
            pl.BlockSpec((1, c, h_tile, w), lambda b, t: (b, 0, t, 0)),
            full((mip, c)), full((mip, 1)),
            full((c, mip)), full((c, 1)),
            full((c, mip)), full((c, 1)),
        ],
        out_specs=(
            pl.BlockSpec((1, h_tile, c), lambda b, t: (b, t, 0)),
            pl.BlockSpec((1, c, w), lambda b, t: (b, 0, 0)),
        ),
        scratch_shapes=[pltpu.VMEM((c, w), jnp.float32)],
        compiler_params=pltpu.CompilerParams(
            dimension_semantics=("parallel", "arbitrary"),
            vmem_limit_bytes=_VMEM_LIMIT),
        cost_estimate=pl.CostEstimate(
            flops=2 * n * c * h * w + 4 * n * mip * c * (h + w),
            transcendentals=2 * n * c * (h + w),
            bytes_accessed=n * c * h * w * itemsize + 4 * n * c * (h + w)),
    )(x, w1f, b1f, wh, bh, ww, bw)

    # ------------------- pass 2: lane-dense gating ----------------------------
    l = h_tile * w
    lane_ids = jnp.arange(l, dtype=jnp.int32)
    spread_h = (lane_ids[None, :] // w
                == jnp.arange(h_tile, dtype=jnp.int32)[:, None]).astype(jnp.float32)
    spread_w = (lane_ids[None, :] % w
                == jnp.arange(w, dtype=jnp.int32)[:, None]).astype(jnp.float32)

    x_flat = x.reshape(n, c, h * w)
    out_flat = pl.pallas_call(
        _gate_kernel,
        out_shape=jax.ShapeDtypeStruct((n, c, h * w), x.dtype),
        grid=(n, ht),
        in_specs=[
            pl.BlockSpec((1, c, h_tile * w), lambda b, t: (b, 0, t)),
            pl.BlockSpec((1, h_tile, c), lambda b, t: (b, t, 0)),
            pl.BlockSpec((1, c, w), lambda b, t: (b, 0, 0)),
            full((h_tile, l)), full((w, l)),
        ],
        out_specs=pl.BlockSpec((1, c, h_tile * w), lambda b, t: (b, 0, t)),
        compiler_params=pltpu.CompilerParams(
            dimension_semantics=("parallel", "parallel"),
            vmem_limit_bytes=_VMEM_LIMIT),
        cost_estimate=pl.CostEstimate(
            flops=4 * n * c * h * w,
            transcendentals=0,
            bytes_accessed=2 * n * c * h * w * itemsize),
    )(x_flat, a_h, a_w, spread_h, spread_w)

    return out_flat.reshape(n, c, h, w)


# ---------------------------------------------------------------------------
# Pure-JAX reference (same math as the PyTorch module, BN in eval mode).
# ---------------------------------------------------------------------------
def ca_reference(x, p, eps=1e-5):
    n, c, h, w = x.shape
    x_h = jnp.mean(x, axis=3)                    # (N, C, H)
    x_w = jnp.mean(x, axis=2)                    # (N, C, W)
    y = jnp.concatenate([x_h, x_w], axis=2)      # (N, C, H+W)
    y = jnp.einsum("mc,ncl->nml", p["w1"], y) + p["b1"][None, :, None]
    scale = p["gamma"] / jnp.sqrt(p["var"] + eps)
    y = (y - p["mean"][None, :, None]) * scale[None, :, None] + p["beta"][None, :, None]
    y = y * jnp.clip(y + 3.0, 0.0, 6.0) / 6.0
    y_h, y_w = y[:, :, :h], y[:, :, h:]
    a_h = jax.nn.sigmoid(jnp.einsum("cm,nml->ncl", p["wh"], y_h)
                         + p["bh"][None, :, None])       # (N, C, H)
    a_w = jax.nn.sigmoid(jnp.einsum("cm,nml->ncl", p["ww"], y_w)
                         + p["bw"][None, :, None])       # (N, C, W)
    return x * a_w[:, :, None, :] * a_h[:, :, :, None]


if __name__ == "__main__":
    N, C, H, W = 2, 4, 16, 16
    reduction = 32
    MIP = max(8, C // reduction)

    key = jax.random.PRNGKey(0)
    ks = jax.random.split(key, 8)
    x = jax.random.normal(ks[0], (N, C, H, W), dtype=jnp.float32)

    params = {
        "w1": 0.3 * jax.random.normal(ks[1], (MIP, C), jnp.float32),
        "b1": 0.1 * jax.random.normal(ks[2], (MIP,), jnp.float32),
        "gamma": 1.0 + 0.1 * jax.random.normal(ks[3], (MIP,), jnp.float32),
        "beta": 0.1 * jax.random.normal(ks[4], (MIP,), jnp.float32),
        "mean": 0.05 * jnp.ones((MIP,), jnp.float32),
        "var": jnp.ones((MIP,), jnp.float32),
        "wh": 0.3 * jax.random.normal(ks[5], (C, MIP), jnp.float32),
        "bh": 0.1 * jax.random.normal(ks[6], (C,), jnp.float32),
        "ww": 0.3 * jax.random.normal(ks[7], (C, MIP), jnp.float32),
        "bw": jnp.zeros((C,), jnp.float32),
    }

    # float32 path
    out = jax.block_until_ready(ca_forward(x, params))
    ref = ca_reference(x, params)
    assert out.shape == (N, C, H, W)
    assert out.dtype == x.dtype
    assert jnp.allclose(out, ref, atol=2e-5, rtol=2e-5), "f32 mismatch vs reference"

    # bf16 I/O path (HBM-bandwidth saving; math stays f32 inside the kernels)
    x_bf = x.astype(jnp.bfloat16)
    out_bf = jax.block_until_ready(ca_forward(x_bf, params))
    ref_bf = ca_reference(x_bf.astype(jnp.float32), params)
    assert out_bf.dtype == jnp.bfloat16
    assert jnp.allclose(out_bf.astype(jnp.float32), ref_bf, atol=0.05, rtol=0.05), \
        "bf16 mismatch vs reference"

    print("KERNEL_OK")
</pallas_src>

<mosaic_0001>
module attributes {stable_mosaic.version = 11 : i64} {
  func.func @_pool_attn_kernel(%arg0: i32, %arg1: i32, %arg2: memref<1x4x16x16xf32, #tpu.memory_space<vmem>>, %arg3: memref<8x4xf32, #tpu.memory_space<vmem>>, %arg4: memref<8x1xf32, #tpu.memory_space<vmem>>, %arg5: memref<4x8xf32, #tpu.memory_space<vmem>>, %arg6: memref<4x1xf32, #tpu.memory_space<vmem>>, %arg7: memref<4x8xf32, #tpu.memory_space<vmem>>, %arg8: memref<4x1xf32, #tpu.memory_space<vmem>>, %arg9: memref<1x16x4xf32, #tpu.memory_space<vmem>>, %arg10: memref<1x4x16xf32, #tpu.memory_space<vmem>>, %arg11: memref<4x16xf32, #tpu.memory_space<vmem>>) attributes {dimension_semantics = [#tpu.dimension_semantics<parallel>, #tpu.dimension_semantics<arbitrary>], iteration_bounds = array<i64: 2, 1>, scalar_prefetch = 0 : i64, scratch_operands = 1 : i64, tpu.core_type = #tpu.core_type<tc>, window_params = [{transform_indices = @transform_0, window_bounds = array<i64: 1, 4, 16, 16>}, {pipeline_mode = #tpu.pipeline_mode<synchronous>, transform_indices = @transform_1, window_bounds = array<i64: 8, 4>}, {pipeline_mode = #tpu.pipeline_mode<synchronous>, transform_indices = @transform_2, window_bounds = array<i64: 8, 1>}, {pipeline_mode = #tpu.pipeline_mode<synchronous>, transform_indices = @transform_3, window_bounds = array<i64: 4, 8>}, {pipeline_mode = #tpu.pipeline_mode<synchronous>, transform_indices = @transform_4, window_bounds = array<i64: 4, 1>}, {pipeline_mode = #tpu.pipeline_mode<synchronous>, transform_indices = @transform_5, window_bounds = array<i64: 4, 8>}, {pipeline_mode = #tpu.pipeline_mode<synchronous>, transform_indices = @transform_6, window_bounds = array<i64: 4, 1>}, {transform_indices = @transform_7, window_bounds = array<i64: 1, 16, 4>}, {transform_indices = @transform_8, window_bounds = array<i64: 1, 4, 16>}]} {
    %c0 = arith.constant 0 : index
    %c0_0 = arith.constant 0 : index
    %c0_1 = arith.constant 0 : index
    %c0_2 = arith.constant 0 : index
    %0 = vector.load %arg2[%c0, %c0_0, %c0_1, %c0_2] : memref<1x4x16x16xf32, #tpu.memory_space<vmem>>, vector<1x4x16x16xf32>
    %1 = vector.shape_cast %0 : vector<1x4x16x16xf32> to vector<4x16x16xf32>
    %cst = arith.constant dense<0.000000e+00> : vector<4x16xf32>
    %2 = vector.multi_reduction <add>, %1, %cst [2] : vector<4x16x16xf32> to vector<4x16xf32>
    %cst_3 = arith.constant 1.600000e+01 : f32
    %3 = vector.broadcast %cst_3 : f32 to vector<4x16xf32>
    %4 = arith.divf %2, %3 : vector<4x16xf32>
    %c0_4 = arith.constant 0 : index
    %c0_5 = arith.constant 0 : index
    %5 = vector.load %arg3[%c0_4, %c0_5] : memref<8x4xf32, #tpu.memory_space<vmem>>, vector<8x4xf32>
    %cst_6 = arith.constant dense<0.000000e+00> : vector<8x16xf32>
    %6 = tpu.matmul %5, %4, %cst_6 {dimension_numbers = #tpu.dot_dimension_numbers<[1], [0], [0], [1], [0, 0, 1, 1], [], []>} : vector<8x4xf32>, vector<4x16xf32>, vector<8x16xf32> -> vector<8x16xf32>
    %c0_7 = arith.constant 0 : index
    %c0_8 = arith.constant 0 : index
    %7 = vector.load %arg4[%c0_7, %c0_8] : memref<8x1xf32, #tpu.memory_space<vmem>>, vector<8x1xf32>
    %8 = vector.broadcast %7 : vector<8x1xf32> to vector<8x16xf32>
    %9 = arith.addf %6, %8 : vector<8x16xf32>
    %cst_9 = arith.constant 3.000000e+00 : f32
    %10 = vector.broadcast %cst_9 : f32 to vector<8x16xf32>
    %11 = arith.addf %9, %10 : vector<8x16xf32>
    %cst_10 = arith.constant 0.000000e+00 : f32
    %cst_11 = arith.constant 6.000000e+00 : f32
    %12 = vector.broadcast %cst_10 : f32 to vector<8x16xf32>
    %13 = arith.maximumf %12, %11 : vector<8x16xf32>
    %14 = vector.broadcast %cst_11 : f32 to vector<8x16xf32>
    %15 = arith.minimumf %14, %13 : vector<8x16xf32>
    %16 = arith.mulf %9, %15 : vector<8x16xf32>
    %cst_12 = arith.constant 0.166666672 : f32
    %17 = vector.broadcast %cst_12 : f32 to vector<8x16xf32>
    %18 = arith.mulf %16, %17 : vector<8x16xf32>
    %c0_13 = arith.constant 0 : index
    %c0_14 = arith.constant 0 : index
    %19 = vector.load %arg5[%c0_13, %c0_14] : memref<4x8xf32, #tpu.memory_space<vmem>>, vector<4x8xf32>
    %cst_15 = arith.constant dense<0.000000e+00> : vector<4x16xf32>
    %20 = tpu.matmul %19, %18, %cst_15 {dimension_numbers = #tpu.dot_dimension_numbers<[1], [0], [0], [1], [0, 0, 1, 1], [], []>} : vector<4x8xf32>, vector<8x16xf32>, vector<4x16xf32> -> vector<4x16xf32>
    %c0_16 = arith.constant 0 : index
    %c0_17 = arith.constant 0 : index
    %21 = vector.load %arg6[%c0_16, %c0_17] : memref<4x1xf32, #tpu.memory_space<vmem>>, vector<4x1xf32>
    %22 = vector.broadcast %21 : vector<4x1xf32> to vector<4x16xf32>
    %23 = arith.addf %20, %22 : vector<4x16xf32>
    %24 = arith.negf %23 : vector<4x16xf32>
    %25 = math.exp %24 : vector<4x16xf32>
    %cst_18 = arith.constant 1.000000e+00 : f32
    %26 = vector.broadcast %cst_18 : f32 to vector<4x16xf32>
    %27 = arith.addf %26, %25 : vector<4x16xf32>
    %28 = arith.divf %26, %27 : vector<4x16xf32>
    %29 = tpu.transpose %28, [1, 0] : vector<4x16xf32> -> vector<16x4xf32>
    %c0_19 = arith.constant 0 : index
    %c0_20 = arith.constant 0 : index
    %c0_21 = arith.constant 0 : index
    %30 = vector.load %arg9[%c0_19, %c0_20, %c0_21] : memref<1x16x4xf32, #tpu.memory_space<vmem>>, vector<1x16x4xf32>
    %31 = vector.shape_cast %30 : vector<1x16x4xf32> to vector<16x4xf32>
    %32 = vector.shape_cast %29 : vector<16x4xf32> to vector<1x16x4xf32>
    tpu.vector_store %arg9[%c0_19, %c0_20, %c0_21], %32 {strides = array<i32>} : memref<1x16x4xf32, #tpu.memory_space<vmem>>, vector<1x16x4xf32>,
    %c0_i32 = arith.constant 0 : i32
    %33 = arith.cmpi eq, %arg1, %c0_i32 : i32
    %34 = arith.extui %33 : i1 to i32
    %c0_i32_22 = arith.constant 0 : i32
    %35 = arith.cmpi ne, %34, %c0_i32_22 : i32
    scf.if %35 {
      %cst_30 = arith.constant 0.000000e+00 : f32
      %43 = vector.broadcast %cst_30 : f32 to vector<4x16xf32>
      %c0_31 = arith.constant 0 : index
      %c0_32 = arith.constant 0 : index
      %44 = vector.load %arg11[%c0_31, %c0_32] : memref<4x16xf32, #tpu.memory_space<vmem>>, vector<4x16xf32>
      tpu.vector_store %arg11[%c0_31, %c0_32], %43 {strides = array<i32>} : memref<4x16xf32, #tpu.memory_space<vmem>>, vector<4x16xf32>,
    } else {
    }
    %c0_23 = arith.constant 0 : index
    %c0_24 = arith.constant 0 : index
    %36 = vector.load %arg11[%c0_23, %c0_24] : memref<4x16xf32, #tpu.memory_space<vmem>>, vector<4x16xf32>
    %cst_25 = arith.constant dense<0.000000e+00> : vector<4x16xf32>
    %37 = vector.multi_reduction <add>, %1, %cst_25 [1] : vector<4x16x16xf32> to vector<4x16xf32>
    %38 = arith.addf %36, %37 : vector<4x16xf32>
    %c0_26 = arith.constant 0 : index
    %c0_27 = arith.constant 0 : index
    %39 = vector.load %arg11[%c0_26, %c0_27] : memref<4x16xf32, #tpu.memory_space<vmem>>, vector<4x16xf32>
    tpu.vector_store %arg11[%c0_26, %c0_27], %38 {strides = array<i32>} : memref<4x16xf32, #tpu.memory_space<vmem>>, vector<4x16xf32>,
    %c0_i32_28 = arith.constant 0 : i32
    %40 = arith.cmpi eq, %arg1, %c0_i32_28 : i32
    %41 = arith.extui %40 : i1 to i32
    %c0_i32_29 = arith.constant 0 : i32
    %42 = arith.cmpi ne, %41, %c0_i32_29 : i32
    scf.if %42 {
      %c0_30 = arith.constant 0 : index
      %c0_31 = arith.constant 0 : index
      %43 = vector.load %arg11[%c0_30, %c0_31] : memref<4x16xf32, #tpu.memory_space<vmem>>, vector<4x16xf32>
      %cst_32 = arith.constant 6.250000e-02 : f32
      %44 = vector.broadcast %cst_32 : f32 to vector<4x16xf32>
      %45 = arith.mulf %43, %44 : vector<4x16xf32>
      %c0_33 = arith.constant 0 : index
      %c0_34 = arith.constant 0 : index
      %46 = vector.load %arg3[%c0_33, %c0_34] : memref<8x4xf32, #tpu.memory_space<vmem>>, vector<8x4xf32>
      %cst_35 = arith.constant dense<0.000000e+00> : vector<8x16xf32>
      %47 = tpu.matmul %46, %45, %cst_35 {dimension_numbers = #tpu.dot_dimension_numbers<[1], [0], [0], [1], [0, 0, 1, 1], [], []>} : vector<8x4xf32>, vector<4x16xf32>, vector<8x16xf32> -> vector<8x16xf32>
      %c0_36 = arith.constant 0 : index
      %c0_37 = arith.constant 0 : index
      %48 = vector.load %arg4[%c0_36, %c0_37] : memref<8x1xf32, #tpu.memory_space<vmem>>, vector<8x1xf32>
      %49 = vector.broadcast %48 : vector<8x1xf32> to vector<8x16xf32>
      %50 = arith.addf %47, %49 : vector<8x16xf32>
      %cst_38 = arith.constant 3.000000e+00 : f32
      %51 = vector.broadcast %cst_38 : f32 to vector<8x16xf32>
      %52 = arith.addf %50, %51 : vector<8x16xf32>
      %cst_39 = arith.constant 0.000000e+00 : f32
      %cst_40 = arith.constant 6.000000e+00 : f32
      %53 = vector.broadcast %cst_39 : f32 to vector<8x16xf32>
      %54 = arith.maximumf %53, %52 : vector<8x16xf32>
      %55 = vector.broadcast %cst_40 : f32 to vector<8x16xf32>
      %56 = arith.minimumf %55, %54 : vector<8x16xf32>
      %57 = arith.mulf %50, %56 : vector<8x16xf32>
      %cst_41 = arith.constant 0.166666672 : f32
      %58 = vector.broadcast %cst_41 : f32 to vector<8x16xf32>
      %59 = arith.mulf %57, %58 : vector<8x16xf32>
      %c0_42 = arith.constant 0 : index
      %c0_43 = arith.constant 0 : index
      %60 = vector.load %arg7[%c0_42, %c0_43] : memref<4x8xf32, #tpu.memory_space<vmem>>, vector<4x8xf32>
      %cst_44 = arith.constant dense<0.000000e+00> : vector<4x16xf32>
      %61 = tpu.matmul %60, %59, %cst_44 {dimension_numbers = #tpu.dot_dimension_numbers<[1], [0], [0], [1], [0, 0, 1, 1], [], []>} : vector<4x8xf32>, vector<8x16xf32>, vector<4x16xf32> -> vector<4x16xf32>
      %c0_45 = arith.constant 0 : index
      %c0_46 = arith.constant 0 : index
      %62 = vector.load %arg8[%c0_45, %c0_46] : memref<4x1xf32, #tpu.memory_space<vmem>>, vector<4x1xf32>
      %63 = vector.broadcast %62 : vector<4x1xf32> to vector<4x16xf32>
      %64 = arith.addf %61, %63 : vector<4x16xf32>
      %65 = arith.negf %64 : vector<4x16xf32>
      %66 = math.exp %65 : vector<4x16xf32>
      %cst_47 = arith.constant 1.000000e+00 : f32
      %67 = vector.broadcast %cst_47 : f32 to vector<4x16xf32>
      %68 = arith.addf %67, %66 : vector<4x16xf32>
      %69 = arith.divf %67, %68 : vector<4x16xf32>
      %c0_48 = arith.constant 0 : index
      %c0_49 = arith.constant 0 : index
      %c0_50 = arith.constant 0 : index
      %70 = vector.load %arg10[%c0_48, %c0_49, %c0_50] : memref<1x4x16xf32, #tpu.memory_space<vmem>>, vector<1x4x16xf32>
      %71 = vector.shape_cast %70 : vector<1x4x16xf32> to vector<4x16xf32>
      %72 = vector.shape_cast %69 : vector<4x16xf32> to vector<1x4x16xf32>
      tpu.vector_store %arg10[%c0_48, %c0_49, %c0_50], %72 {strides = array<i32>} : memref<1x4x16xf32, #tpu.memory_space<vmem>>, vector<1x4x16xf32>,
    } else {
    }
    return
  }
  func.func @transform_0(%arg0: i32, %arg1: i32) -> (i32, i32, i32, i32) {
    %c0_i32 = arith.constant 0 : i32
    %c0_i32_0 = arith.constant 0 : i32
    %c0_i32_1 = arith.constant 0 : i32
    return %arg0, %c0_i32, %arg1, %c0_i32_0 : i32, i32, i32, i32
  }
  func.func @transform_1(%arg0: i32, %arg1: i32) -> (i32, i32) {
    %c0_i32 = arith.constant 0 : i32
    %c0_i32_0 = arith.constant 0 : i32
    %c0_i32_1 = arith.constant 0 : i32
    return %c0_i32, %c0_i32_0 : i32, i32
  }
  func.func @transform_2(%arg0: i32, %arg1: i32) -> (i32, i32) {
    %c0_i32 = arith.constant 0 : i32
    %c0_i32_0 = arith.constant 0 : i32
    %c0_i32_1 = arith.constant 0 : i32
    return %c0_i32, %c0_i32_0 : i32, i32
  }
  func.func @transform_3(%arg0: i32, %arg1: i32) -> (i32, i32) {
    %c0_i32 = arith.constant 0 : i32
    %c0_i32_0 = arith.constant 0 : i32
    %c0_i32_1 = arith.constant 0 : i32
    return %c0_i32, %c0_i32_0 : i32, i32
  }
  func.func @transform_4(%arg0: i32, %arg1: i32) -> (i32, i32) {
    %c0_i32 = arith.constant 0 : i32
    %c0_i32_0 = arith.constant 0 : i32
    %c0_i32_1 = arith.constant 0 : i32
    return %c0_i32, %c0_i32_0 : i32, i32
  }
  func.func @transform_5(%arg0: i32, %arg1: i32) -> (i32, i32) {
    %c0_i32 = arith.constant 0 : i32
    %c0_i32_0 = arith.constant 0 : i32
    %c0_i32_1 = arith.constant 0 : i32
    return %c0_i32, %c0_i32_0 : i32, i32
  }
  func.func @transform_6(%arg0: i32, %arg1: i32) -> (i32, i32) {
    %c0_i32 = arith.constant 0 : i32
    %c0_i32_0 = arith.constant 0 : i32
    %c0_i32_1 = arith.constant 0 : i32
    return %c0_i32, %c0_i32_0 : i32, i32
  }
  func.func @transform_7(%arg0: i32, %arg1: i32) -> (i32, i32, i32) {
    %c0_i32 = arith.constant 0 : i32
    %c0_i32_0 = arith.constant 0 : i32
    return %arg0, %arg1, %c0_i32 : i32, i32, i32
  }
  func.func @transform_8(%arg0: i32, %arg1: i32) -> (i32, i32, i32) {
    %c0_i32 = arith.constant 0 : i32
    %c0_i32_0 = arith.constant 0 : i32
    %c0_i32_1 = arith.constant 0 : i32
    return %arg0, %c0_i32, %c0_i32_0 : i32, i32, i32
  }
}

</mosaic_0001>

<bundles_post_ra>
// kernel: tpu_custom_call.1
= control target key start
LH: loop header
LB: loop body
LE: loop exit
PB: predicated region body
PF: predicated region fallthrough
CT: control target
= control target key end

     0   :  { %14 = vsyncpa [#allocation4], 0  ;;  %s1535_s0 = inlined_call_operand.hbm [shape: f32[2,4,16,16], index: 0, kind: input, shape index: {}]   ;;  %s1536_s1 = inlined_call_operand.vmem [shape: f32[8,4], index: 1, kind: input, shape index: {}]   ;;  %s1537_s2 = inlined_call_operand.vmem [shape: f32[8,1], index: 2, kind: input, shape index: {}]   ;;  %s1538_s3 = inlined_call_operand.vmem [shape: f32[4,8], index: 3, kind: input, shape index: {}]   ;;  %s1539_s4 = inlined_call_operand.vmem [shape: f32[4,1], index: 4, kind: input, shape index: {}]   ;;  %s1540_s5 = inlined_call_operand.vmem [shape: f32[4,8], index: 5, kind: input, shape index: {}]   ;;  %s1541_s6 = inlined_call_operand.vmem [shape: f32[4,1], index: 6, kind: input, shape index: {}]   ;;  %s1542_s7 = inlined_call_operand.vmem [shape: f32[2,16,4], index: 7, kind: output, shape index: {0}]   ;;  %s1543_s8 = inlined_call_operand.hbm [shape: f32[2,4,16], index: 8, kind: output, shape index: {1}]  }
   0x1   :  { %16 = vsyncpa [#allocation4 + $0x1], 0 }
   0x2   :  { %17 = vsyncpa [#allocation5], 0 }
   0x3   :  { %19 = vsyncpa [#allocation5 + $0x1], 0  ;;  %s1335_s27 = smov 0   ;;  %s1337_s28 = smov 0  }
   0x4   :  { %s1339_s29 = smov 0   ;;  %s1341_s30 = smov 0  }
   0x5   :  { %s1343_s9 = smov 0   ;;  %s1345_s10 = smov 0  }
   0x6 LB: > { %1546 = sst [smem:[#allocation9_spill]] %s1277_s9  ;;  %s1042_s11 = sadd.s32 4294967295, %s1281_s10   ;;  %s1281_s10 = sphi %s1345_s10, %s25_s10   ;;  %s1277_s9 = sphi %s1343_s9, %s1555_s9   ;;  %s1273_s30 = sphi %s1341_s30, %s1554_s30   ;;  %s1269_s29 = sphi %s1339_s29, %s1558_s29   ;;  %s1265_s28 = sphi %s1337_s28, %s1557_s28   ;;  %s1261_s27 = sphi %s1335_s27, %s1556_s27  }
   0x7   : > { %s1043_s12 = sadd.s32 4294967294, %s1281_s10   ;;  %s37_s13 = sadd.s32 1, %s1277_s9 }
   0x8   : > { %s46_s14 = sadd.s32 1, %s1269_s29  ;;  %p39_p0 = scmp.ge.s32.totalorder %s37_s13, 2 }
   0x9   : > { %p53_p1 = scmp.ne.s32.totalorder %s1269_s29, %s1265_s28  ;;  %p54_p2 = scmp.eq.s32.totalorder %s1281_s10, 0 }
   0xa   : > { %p59_p3 = scmp.ne.s32.totalorder %s1265_s28, %s1261_s27  ;;  %s1560_s13 = smov (%p39_p0, %s37_s13), 0 }
   0xb   : > { %1547 = sst [smem:[#allocation10_spill]] %s1560_s13  ;;  %p1376_p4 = por %p54_p2, %p53_p1 }
   0xc   : > { %p60_p5 = scmp.eq.s32.totalorder %s1042_s11, 0  ;;  %s41_s16 = ssub.s32 %s1277_s9, %s1560_s13 }
   0xd   : > { %p237_p6 = scmp.eq.s32.totalorder %s1042_s11, 1  ;;  %p44_p7 = scmp.eq.s32.totalorder %s41_s16, 0 }
   0xe   : > { %p1382_p8 = por %p60_p5, %p59_p3  ;;  %p243_p10 = scmp.eq.s32.totalorder %s1043_s12, 1 }
   0xf   : > { %p1386_p9 = por %p237_p6, %p53_p1  ;;  %p1108_p13 = scmp.lt.s32.totalorder %s1281_s10, 2 }
  0x10   : > { %s1391_s19 = scalar_select %p44_p7, %s1269_s29, %s46_s14  }
  0x11   : > { %p1393_p11 = por %p243_p10, %p59_p3  ;;  %s281_s21 = sand.u32 1, %s1269_s29  }
  0x12   : > { %s1046_s22 = sshll.u32 %s281_s21, 6  ;;  %s1066_s23 = sshll.u32 %s1277_s9, 10 }
  0x13   : > { %s293_s26 = scalar_lea.hbm %s1535_s0, %s1066_s23  ;;  %s285_s11 = scalar_lea.vmem [#allocation3], %s1046_s22 }
  0x14   : > { %s294_s16 = sshll.u32 %s285_s11, 4  ;;  %p1406_p0 = pnand %p1108_p13, %p1376_p4  ;;  %s295_s16 = int_to_ptr.vmem [resolvable:$true] %s294_s16 }
  0x15   : > { %p1049_p1 = scmp.ge.s32.totalorder %s1281_s10, 1  ;;  %s282_s14 = scalar_lea.sflag [#allocation4], %s281_s21 }
  0x16   : > { %p1175_p2 = pneg %p1406_p0  ;;  %s1186_s13 = scalar_lea.vmem %s295_s16, 1024 }
  0x17   : > { %p1187_p3 = scmp.ne.s32.totalorder %s295_s16, %s1186_s13  ;;  %s1283_s9 = smov [#allocation3]  }
  0x18   : > { %s1191_s24 = sshll.u32 %s1283_s9, 4  ;;  %s1192_s24 = int_to_ptr.vmem [resolvable:$false] %s1191_s24 }
  0x19   : > { %p1189_p5 = pnand %p1187_p3, %p1175_p2  ;;  %s1193_s22 = scalar_lea.vmem %s1192_s24, 2048 }
  0x1a   : > { %p1194_p7 = scmp.lt.s32.totalorder %s295_s16, %s1192_s24  ;;  %p1195_p10 = scmp.lt.s32.totalorder %s1193_s22, %s1186_s13 }
  0x1b   : > { %p1190_p6 = pneg %p1189_p5 }
  0x1c   : > { %p1196_p12 = por %p1195_p10, %p1194_p7 }
  0x1e   : > { %p1197_p4 = pnand %p1196_p12, %p1190_p6 }
  0x20   : > { %1200 = shalt.err (!%p1197_p4)
}
  0x21   : > { %s1284_s15 = smov 128   ;;  %s1285_s21 = smov 8  }
  0x22   : > { %1103 = dma.hbm_to_vmem [thread:$0]  (!%p1406_p0), %s293_s26, 1024, %s295_s16, %s282_s14, %s1284_s15, %s1284_s15, %s1285_s21  }
  0x23   : > { %p302_p13 = scmp.lt.s32.totalorder %s1281_s10, 3 }
  0x25   : > { %p303_p2 = pnand %p1049_p1, %p302_p13 }
  0x26   : > { %s1419_s9 = sand.u32 (!%p303_p2), 1, %s1265_s28  }
  0x27   : > { %306 = sbr.rel (%p303_p2) target bundleno = 767 (0x2ff), region = 48  ;;  %s1050_s13 = sshll.u32 (!%p303_p2), %s1419_s9, 6 }
  0x28   : > { %s309_s23 = scalar_lea.sflag (!%p303_p2), [#allocation4], %s1419_s9  ;;  %s312_s25 = scalar_lea.vmem (!%p303_p2), [#allocation3], %s1050_s13 }
  0x2c   : > { %1252 = dma.done.wait (%p1382_p8), %s309_s23, 1024  }
  0x2d   : > { %1254 = vsyncadd (%p1382_p8), %s309_s23, 4294966272  ;;  %vm373_vm0 = vcmask 130048   ;;  %v367_v0 = vld [vmem:[%s312_s25 + $0x10] sm:$0xff]  ;;  %v365_v1 = vld [vmem:[%s312_s25] sm:$0xff]  ;;  %vm675_vm1 = vcmask 125952   ;;  %v1286_v40 = vmov 0.0   ;;  %v422_v53 = vlaneseq }
  0x2e   : > { %v368_v2 = vld [vmem:[%s312_s25 + $0x18] sm:$0xff]  ;;  %v380_v3 = vsel %vm373_vm0, %v367_v0, 0.0  ;;  %v374_v4 = vsel %vm373_vm0, %v365_v1, 0.0  ;;  %v366_v6 = vld [vmem:[%s312_s25 + $0x8] sm:$0xff]  ;;  %v369_v8 = vld [vmem:[%s312_s25 + $0x20] sm:$0xff]  ;;  %1076 = vmatprep.subr.mxu0 %v1286_v40  ;;  %1081 = vmatprep.subr.mxu1 %v1286_v40  ;;  %vm462_vm2 = vcmask 1041409  }
  0x2f   : > { %v383_v5 = vsel %vm373_vm0, %v368_v2, 0.0  ;;  %v370_v7 = vld [vmem:[%s312_s25 + $0x28] sm:$0xff]  ;;  %381 = vadd.xlane.f32.xlu1 %v380_v3  ;;  %375 = vadd.xlane.f32.xlu0 %v374_v4  ;;  %v377_v10 = vsel %vm373_vm0, %v366_v6, 0.0  ;;  %v386_v12 = vsel %vm373_vm0, %v369_v8, 0.0  ;;  %v372_v13 = vld [vmem:[%s312_s25 + $0x38] sm:$0xff]  ;;  %v371_v14 = vld [vmem:[%s312_s25 + $0x30] sm:$0xff] }
  0x30   : > { %v685_v9 = vadd.f32 %v383_v5, %v380_v3  ;;  %v389_v11 = vsel %vm373_vm0, %v370_v7, 0.0  ;;  %v678_v15 = vadd.f32 %v377_v10, %v374_v4  ;;  %v395_v17 = vsel %vm373_vm0, %v372_v13, 0.0  ;;  %676 = vst.msk [vmem:[#allocation2] sm:$0xf] %vm675_vm1, %v1286_v40  ;;  %v408_v50 = vld [vmem:[%s1537_s2] sm:$0xff]  ;;  %s1051_s25 = sshll.u32 %s1419_s9, 2 }
  0x31   : > { %v692_v16 = vadd.f32 %v389_v11, %v386_v12  ;;  %v392_v18 = vsel %vm373_vm0, %v371_v14, 0.0  ;;  %vm464_vm3 = vcmask 1042434   ;;  %vm466_vm4 = vcmask 1043459   ;;  %v551_v52 = vld [vmem:[%s1539_s4] sm:$0xf]  ;;  %s1063_s17 = sshll.u32 %s1273_s30, 6 }
  0x32   : > { %v686_v19 = vrot.slane %v685_v9, 4  ;;  %v699_v20 = vadd.f32 %v395_v17, %v392_v18  ;;  %v679_v21 = vrot.slane %v678_v15, 4  ;;  %vm1287_vm5 = vmmov 0   ;;  %s353_s26 = scalar_lea.vmem [#allocation6], %s1051_s25  ;;  %s1485_s14 = scalar_lea.hbm %s1543_s8, %s1063_s17 }
  0x33   : > { %v693_v22 = vrot.slane %v692_v16, 4  ;;  %384 = vadd.xlane.f32.xlu1 %v383_v5  ;;  %378 = vadd.xlane.f32.xlu0 %v377_v10  ;;  %v1288_v51 = vmov 0   ;;  %v423_v54 = vand.u32 127, %v422_v53  ;;  %v425_v58 = vshrl.u32 %v422_v53, 7  ;;  %s924_s11 = sshll.u32 %s353_s26, 4  ;;  %s907_s24 = scalar_lea.sflag [#allocation5], %s1419_s9  ;;  %s925_s11 = int_to_ptr.vmem [resolvable:$true] %s924_s11 }
  0x34   : > { %v687_v23 = vadd.f32 %v686_v19, %v685_v9  ;;  %v700_v24 = vrot.slane %v699_v20, 4  ;;  %v680_v25 = vadd.f32 %v679_v21, %v678_v15  ;;  %1078 = vmatprep.mubr.msk.f32.mxu0 %vm1287_vm5, %v1286_v40  ;;  %1083 = vmatprep.mubr.msk.f32.mxu1 %vm1287_vm5, %v1286_v40  ;;  %vm433_vm6 = vcmask 130112   ;;  %s1201_s22 = scalar_lea.vmem %s925_s11, 64  ;;  %s1289_s15 = smov [#allocation6]  }
  0x35   : > { %v694_v26 = vadd.f32 %v693_v22, %v692_v16  ;;  %1163 = vset.pattern.permute.xlu0 %v1288_v51  ;;  %1164 = vset.pattern.permute.xlu1 %v1288_v51  ;;  %v428_v57 = vadd.s32 4294967288, %v423_v54  ;;  %v426_v0 = vsub.s32 %v423_v54, %v425_v58  ;;  %vm472_vm7 = vcmask 1043456   ;;  %p1202_p8 = scmp.ne.s32.totalorder %s925_s11, %s1201_s22  ;;  %s1205_s21 = sshll.u32 %s1289_s15, 4  ;;  %s1206_s21 = int_to_ptr.vmem [resolvable:$false] %s1205_s21 }
  0x36   : > { %v688_v27 = vrot.slane %v687_v23, 2  ;;  %v701_v28 = vadd.f32 %v700_v24, %v699_v20  ;;  %v681_v29 = vrot.slane %v680_v25, 2  ;;  %vm468_vm8 = vcmask 31744   ;;  %s1207_s13 = scalar_lea.vmem %s1206_s21, 128  ;;  %p1208_p1 = scmp.lt.s32.totalorder %s925_s11, %s1206_s21 }
  0x37   : > { %v695_v30 = vrot.slane %v694_v26, 2  ;;  %390 = vadd.xlane.f32.xlu1 %v389_v11  ;;  %387 = vadd.xlane.f32.xlu0 %v386_v12  ;;  %v677_v47 = vld [vmem:[#allocation2] sm:$0xf]  ;;  %v431_v61 = vsub.s32 %v428_v57, %v425_v58  ;;  %vm557_vm9 = vcmask 64512   ;;  %p1203_p12 = pnand %p1202_p8, %p1386_p9  ;;  %p1209_p3 = scmp.lt.s32.totalorder %s1207_s13, %s1201_s22 }
  0x38   : > { %v689_v31 = vadd.f32 %v688_v27, %v687_v23  ;;  %v702_v32 = vrot.slane %v701_v28, 2  ;;  %v682_v33 = vadd.f32 %v681_v29, %v680_v25  ;;  %v811_v29 = vld [vmem:[%s1541_s6] sm:$0xf] }
  0x39   : > { %v696_v34 = vadd.f32 %v695_v30, %v694_v26  ;;  %v407_v26 = vld [vmem:[%s1536_s1] sm:$0xff]  ;;  %p1204_p0 = pneg %p1203_p12  ;;  %p1210_p5 = por %p1209_p3, %p1208_p1 }
  0x3a   : > { %v690_v35 = vrot.slane %v689_v31, 1  ;;  %v703_v36 = vadd.f32 %v702_v32, %v701_v28  ;;  %v683_v37 = vrot.slane %v682_v33, 1 }
  0x3b   : > { %v697_v38 = vrot.slane %v696_v34, 1  ;;  %396 = vadd.xlane.f32.xlu1 %v395_v17  ;;  %393 = vadd.xlane.f32.xlu0 %v392_v18  ;;  %p1211_p6 = pnand %p1210_p5, %p1204_p0 }
  0x3c   : > { %v704_v39 = vrot.slane %v703_v36, 1  ;;  %v691_v41 = vadd.f32 %v690_v35, %v689_v31  ;;  %v684_v42 = vadd.f32 %v683_v37, %v682_v33 }
  0x3d   : > { %v698_v43 = vadd.f32 %v697_v38, %v696_v34 }
  0x3e   : > { %v705_v44 = vadd.f32 %v704_v39, %v703_v36  ;;  %v710_v45 = vsel %vm462_vm2, %v691_v41, %v684_v42 }
  0x3f   : > { %v711_v46 = vsel %vm464_vm3, %v698_v43, %v710_v45 }
  0x40   : > { %v712_v48 = vsel %vm466_vm4, %v705_v44, %v711_v46 }
  0x41   : > { %v714_v49 = vadd.f32 %v712_v48, %v677_v47  ;;  %v550_v47 = vld [vmem:[%s1538_s3] sm:$0xf] }
  0x43   : > { %716 = vst.msk [vmem:[#allocation2] sm:$0xf] %vm675_vm1, %v714_v49 }
  0x4a   : > { %v720_v20 = vld [vmem:[#allocation2] sm:$0xf] }
  0x4b   : > { %v721_v27 = vmul.f32 0.0625, %v720_v20 }
  0x4c   : > { %726 = vperm.xlu1 %1164, %v408_v50  }
  0x50   : > { %554 = vperm.xlu1 %1164, %v551_v52  }
  0x51   : > { %411 = vperm.xlu0 %1163, %v408_v50   ;;  %v810_v50 = vld [vmem:[%s1540_s5] sm:$0xf] }
  0x54   : > { %814 = vperm.xlu1 %1164, %v811_v29  }
  0xb8   : > { %v382_v55 = vpop.xlane.xlu1 %381  ;;  %v376_v56 = vpop.xlane.xlu0 %375 }
  0xb9   : > { %v401_v1 = vmul.f32 0.0625, %v382_v55  ;;  %v399_v2 = vmul.f32 0.0625, %v376_v56 }
  0xbb   : > { %v438_v9 = vrot.slane %v401_v1, %v426_v0  ;;  %v427_v10 = vrot.slane %v399_v2, %v426_v0 }
  0xbc   : > { %v385_v59 = vpop.xlane.xlu1 %384  ;;  %v379_v60 = vpop.xlane.xlu0 %378 }
  0xbd   : > { %v402_v62 = vmul.f32 0.0625, %v385_v59  ;;  %v400_v63 = vmul.f32 0.0625, %v379_v60 }
  0xbf   : > { %v442_v5 = vrot.slane %v402_v62, %v431_v61  ;;  %v432_v6 = vrot.slane %v400_v63, %v431_v61 }
  0xc0   : > { %v391_v3 = vpop.xlane.xlu1 %390  ;;  %v388_v4 = vpop.xlane.xlu0 %387 }
  0xc1   : > { %v404_v7 = vmul.f32 0.0625, %v391_v3  ;;  %v403_v8 = vmul.f32 0.0625, %v388_v4  ;;  %v443_v15 = vsel %vm433_vm6, %v442_v5, %v438_v9  ;;  %v434_v16 = vsel %vm433_vm6, %v432_v6, %v427_v10 }
  0xc2   : > { %v463_v23 = vsel %vm462_vm2, %v443_v15, %v434_v16 }
  0xc3   : > { %v451_v11 = vrot.slane %v404_v7, %v431_v61  ;;  %v447_v12 = vrot.slane %v403_v8, %v426_v0 }
  0xc4   : > { %v397_v13 = vpop.xlane.xlu1 %396  ;;  %v394_v14 = vpop.xlane.xlu0 %393 }
  0xc5   : > { %v406_v17 = vmul.f32 0.0625, %v397_v13  ;;  %v405_v18 = vmul.f32 0.0625, %v394_v14  ;;  %v452_v19 = vsel %vm433_vm6, %v451_v11, %v447_v12 }
  0xc6   : > { %v465_v25 = vsel %vm464_vm3, %v452_v19, %v463_v23 }
  0xc7   : > { %v460_v21 = vrot.slane %v406_v17, %v431_v61  ;;  %v456_v22 = vrot.slane %v405_v18, %v426_v0 }
  0xc8   : > { %v727_v34 = vpop.permute.xlu1 %726 }
  0xc9   : > { %v461_v24 = vsel %vm433_vm6, %v460_v21, %v456_v22 }
  0xca   : > { %v467_v28 = vsel %vm466_vm4, %v461_v24, %v465_v25 }
  0xcb   : > { %1077 = vmatpush3.msk.msra.mxu0 %vm472_vm7, %v467_v28 }
  0xcc   : > { %1079 = vmatmul.mubr.msk.f32.vlgmr.msra.gmra.mxu0 %vm468_vm8, %v407_v26  ;;  %1086 = vmatprep.subr.mxu0 %v1286_v40  ;;  %v412_v30 = vpop.permute.xlu0 %411  ;;  %v555_v51 = vpop.permute.xlu1 %554 }
  0xcd   : > { %1087 = vmatpush3.msk.msra.mxu0 %vm472_vm7, %v721_v27  ;;  %1088 = vmatprep.mubr.msk.f32.mxu0 %vm1287_vm5, %v1286_v40 }
  0xd0   : > { %1089 = vmatmul.mubr.msk.f32.vlgmr.msra.gmra.mxu0 %vm468_vm8, %v407_v26  ;;  %v815_v56 = vpop.permute.xlu1 %814 }
 0x18c   : > { %v541_v31 = vpop.f32.mrf.mxu0 }
 0x18d   : > { %v542_v32 = vadd.f32 %v541_v31, %v412_v30 }
 0x18e   : > { %v1080_v33 = vpop.f32.mrf.mxu0 }
 0x18f   : > { %v545_v35 = vadd.f32 3.0, %v542_v32 }
 0x190   : > { %v801_v36 = vpop.f32.mrf.mxu0 }
 0x191   : > { %v546_v37 = vmax.f32 %v545_v35, 0.0  ;;  %v802_v38 = vadd.f32 %v801_v36, %v727_v34 }
 0x192   : > { %v1090_v39 = vpop.f32.mrf.mxu0 }
 0x193   : > { %v547_v41 = vmin.f32 %v546_v37, 6.0  ;;  %v805_v42 = vadd.f32 3.0, %v802_v38 }
 0x195   : > { %v806_v43 = vmax.f32 %v805_v42, 0.0  ;;  %v548_v44 = vmul.f32 %v547_v41, %v542_v32 }
 0x197   : > { %v807_v45 = vmin.f32 %v806_v43, 6.0  ;;  %v549_v46 = vmul.f32 0.16666667, %v548_v44 }
 0x199   : > { %v808_v48 = vmul.f32 %v807_v45, %v802_v38  ;;  %1082 = vmatpush3.msra.mxu1 %v549_v46 }
 0x19a   : > { %1084 = vmatmul.mubr.msk.f32.vlgmr.msra.gmra.mxu1 %vm557_vm9, %v550_v47  ;;  %1091 = vmatprep.subr.mxu1 %v1286_v40 }
 0x19b   : > { %v809_v49 = vmul.f32 0.16666667, %v808_v48  ;;  %1093 = vmatprep.mubr.msk.f32.mxu1 %vm1287_vm5, %v1286_v40 }
 0x19d   : > { %1092 = vmatpush3.msra.mxu1 %v809_v49 }
 0x19e   : > { %1094 = vmatmul.mubr.msk.f32.vlgmr.msra.gmra.mxu1 %vm557_vm9, %v810_v50 }
 0x25a   : > { %v627_v52 = vpop.f32.mrf.mxu1 }
 0x25b   : > { %v628_v53 = vadd.f32 %v627_v52, %v555_v51 }
 0x25c   : > { %v1085_v54 = vpop.f32.mrf.mxu1 }
 0x25d   : > { %v1057_v55 = vmul.f32 -1.442695, %v628_v53 }
 0x25e   : > { %v886_v57 = vpop.f32.mrf.mxu1 }
 0x25f   : > { %1165 = vpow2.f32 %v1057_v55  ;;  %v887_v58 = vadd.f32 %v886_v57, %v815_v56 }
 0x260   : > { %v1095_v59 = vpop.f32.mrf.mxu1 }
 0x261   : > { %v1061_v60 = vmul.f32 -1.442695, %v887_v58 }
 0x263   : > { %1167 = vpow2.f32 %v1061_v60 }
 0x26c   : > { %v1166_v40 = vpop.eup %1165 }
 0x26d   : > { %v634_v61 = vadd.f32 1.0, %v1166_v40 }
 0x26f   : > { %1169 = vrcp.f32 %v634_v61 }
 0x270   : > { %v1168_v62 = vpop.eup %1167 }
 0x271   : > { %v893_v63 = vadd.f32 1.0, %v1168_v62 }
 0x273   : > { %1171 = vrcp.f32 %v893_v63 }
 0x27c   : > { %v1170_v0 = vpop.eup %1169 }
 0x27d   : > { %637 = vxpose.xlu1.b32.start.end [1/1] (short) (narrow) %v1170_v0, 16 }
 0x280   : > { %v1172_v1 = vpop.eup %1171 }
 0x281   : > { %896 = vst.msk [vmem:[%s353_s26] sm:$0xf] %vm675_vm1, %v1172_v1 }
 0x282   : > { %1214 = shalt.err (!%p1211_p6)
}
 0x283   : > { %s1215_s23 = scalar_lea.hbm %s1485_s14, 64  ;;  %s1219_s17 = scalar_lea.hbm %s1543_s8, 128 }
 0x284   : > { %p1216_p7 = scmp.ne.s32.totalorder %s1485_s14, %s1215_s23  ;;  %p1220_p13 = scmp.lt.s32.totalorder %s1485_s14, %s1543_s8 }
 0x285   : > { %p1221_p2 = scmp.lt.s32.totalorder %s1219_s17, %s1215_s23 }
 0x286   : > { %p1217_p10 = pnand %p1216_p7, %p1386_p9 }
 0x287   : > { %p1222_p8 = por %p1221_p2, %p1220_p13 }
 0x288   : > { %p1218_p4 = pneg %p1217_p10 }
 0x28a   : > { %p1223_p12 = pnand %p1222_p8, %p1218_p4 }
 0x28c   : > { %1226 = shalt.err (!%p1223_p12)
}
 0x28d   : > { %1098 = dma.vmem_to_hbm [thread:$0]  (%p1386_p9), %s925_s11, 64, %s1485_s14, %s907_s24  }
 0x28e   : > { %p356_p0 = scmp.lt.s32.totalorder %s1273_s30, 1 }
 0x290   : > { %s1562_s30 = smov (!%p356_p0, %s1273_s30), 1 }
 0x291   : > { %s1067_s12 = sshll.u32 %s1562_s30, 4 }
 0x292   : > { %s363_s21 = scalar_lea.vmem %s1542_s7, %s1067_s12 }
 0x2f9   : > { %v653_v2 = vpop.trf.xlu1 }
 0x2fa   : > { %669 = vst.msk [vmem:[%s363_s21] sm:$0xff] %vm468_vm8, %v653_v2 }
 0x2fd   : > { %v654_v3 = vpop.trf.xlu1 }
 0x2fe   : > { %670 = vst.msk [vmem:[%s363_s21 + $0x8] sm:$0xff] %vm468_vm8, %v654_v3 }
 0x2ff PF: > { %s948_s18 = sand.u32 1, %s1261_s27   ;;  %p1553_p9 = scmp.ge.s32.totalorder %s1281_s10, 2 }
 0x300   : > { %s949_s30 = scalar_lea.sflag [#allocation5], %s948_s18 }
 0x301   : > { %p1105_p1 = pnand %p1553_p9, %p1393_p11 }
 0x303   : > { %p1106_p3 = pneg %p1105_p1 }
 0x305   : > { %1256 = dma.done.wait (%p1106_p3), %s949_s30, 64  }
 0x306   : > { %1258 = vsyncadd (%p1106_p3), %s949_s30, 4294967232  ;;  %s25_s10 = sadd.s32 1, %s1281_s10   ;;  %s1554_s30 = sld [smem:[#allocation9_spill]] }
 0x307   : > { %p22_p5 = scmp.ge.s32.totalorder %s25_s10, 4   ;;  %s1555_s9 = sld [smem:[#allocation10_spill]] }
 0x308   : > { %s1556_s27 = smov %s1265_s28  ;;  %s1557_s28 = smov %s1269_s29 }
 0x309   : > { %s1558_s29 = smov %s1391_s19  ;;  %24 = sbr.rel (!%p22_p5) target bundleno = 6 (0x6), region = 113 }
 0x30e   :  { %954 = vsyncpa [#allocation4], 1 }
 0x30f   :  { %956 = vsyncpa [#allocation4 + $0x1], 1 }
 0x310   :  { %957 = vsyncpa [#allocation5], 1 }
 0x311   :  { %959 = vsyncpa [#allocation5 + $0x1], 1 }

</bundles_post_ra>
